<compile_context>
chip_gen: v5e
topology: v5e:2x2
jax: 0.10.0
libtpu: 0.0.40
codegen_flags: <defaults>
</compile_context>

<pallas_src>
import numpy as np
import jax
import jax.numpy as jnp
from jax.experimental import pallas as pl
from jax.experimental.pallas import tpu as pltpu

NEG_SLOPE = 0.01   # nn.LeakyReLU() default
LANE = 128
SUBLANE = 8


def _round_up(x, m):
    return ((x + m - 1) // m) * m


def fcnet_fused_kernel(x_ref, *refs):
    """Fused weight-normalized MLP: all layers in one kernel invocation.

    x_ref   : (TB, in_dim)        VMEM f32  batch tile of the input (raw in_dim)
    refs    : w_0, b_0, ..., w_{L-1}, b_{L-1}, out_ref
              w_i : (in_rows_i, out_pad_i) VMEM bf16  pre-scaled by g/||v||_F,
                    pre-transposed to MXU-native (K major) layout, zero-padded
              b_i : (1, out_pad_i)         VMEM f32   zero-padded
    out_ref : (TB, out_pad_last)  VMEM f32
    """
    out_ref = refs[-1]
    wb = refs[:-1]
    n_layers = len(wb) // 2

    h = x_ref[...].astype(jnp.float32)
    for i in range(n_layers):
        w = wb[2 * i][...]                        # (in_rows, out_pad) bf16
        b = wb[2 * i + 1][...]                    # (1, out_pad)       f32
        # bf16 MXU matmul, f32 accumulate; K is the RHS major dim -> no vxpose.
        y = jnp.dot(h.astype(jnp.bfloat16), w,
                    preferred_element_type=jnp.float32) + b
        h = jnp.maximum(y, NEG_SLOPE * y)         # LeakyReLU
        # Padded output lanes: zero weights & zero bias -> y = 0 -> max(0,0)=0,
        # so the padded contraction rows of the next layer see exact zeros.

    out_ref[...] = h.astype(out_ref.dtype)


def prepare_fcnet_params(params):
    """One-time, parameter-only prep (outside the per-call path).

    params: list of (v, g, b) in nn.Linear layout, v:(out,in), g:(1,), b:(out,).
    Returns (layers, out_dim) with layers = [(w_bf16, b_f32), ...]:
      w_i : (in_rows_i, out_pad_i) bf16 = pad( (v * g/||v||_F).T )   MXU-native
      b_i : (1, out_pad_i) f32
    Layer-0 keeps its raw contraction dim (no lane padding) so x needs no
    feature-dim padding in HBM; later layers pad K to match the previous
    layer's padded output width.
    """
    layers = []
    for li, (v, g, b) in enumerate(params):
        out_d, in_d = v.shape
        v32 = v.astype(jnp.float32)
        scale = g.astype(jnp.float32)[0] / jnp.sqrt(jnp.sum(v32 * v32))
        w = (v32 * scale).T                                    # (in, out)
        in_rows = in_d if li == 0 else _round_up(in_d, LANE)
        out_pad = _round_up(out_d, LANE)
        w_pad = jnp.zeros((in_rows, out_pad), jnp.float32).at[:in_d, :out_d].set(w)
        b_pad = jnp.zeros((1, out_pad), jnp.float32).at[0, :out_d].set(
            b.astype(jnp.float32))
        layers.append((w_pad.astype(jnp.bfloat16), b_pad))
    out_dim = params[-1][0].shape[0]
    return layers, out_dim


def fcnet_forward(x, prepared):
    """x: (B, dims[0]) f32.  prepared: output of prepare_fcnet_params."""
    layers, out_dim = prepared
    B, in_dim = x.shape
    out_pad_last = layers[-1][0].shape[1]

    # Batch tiling: big tiles amortize the ~0.35us/step overhead.
    if B >= 1024:
        TB = 512
    elif B >= 256:
        TB = 256
    else:
        TB = _round_up(B, SUBLANE)
    B_pad = _round_up(B, TB)
    grid = (B_pad // TB,)
    # TODO(synk): on v7x, when grid == (1,) and per-tile work >> 0.35us, split
    # the batch into 2 tiles so the "parallel" axis can use both TensorCores.

    # Only the batch axis is padded; the feature dim stays raw (no extra HBM op
    # when B is already a tile multiple).
    x_in = x.astype(jnp.float32)
    if B_pad != B:
        x_in = jnp.zeros((B_pad, in_dim), jnp.float32).at[:B].set(x_in)

    flat_wb = [a for wb in layers for a in wb]

    # VMEM budget from the actual footprint (bf16 weights, f32 biases & I/O).
    w_bytes = sum(int(np.prod(w.shape)) * 2 + int(np.prod(b.shape)) * 4
                  for w, b in layers)
    io_bytes = 2 * TB * in_dim * 4 + 2 * TB * out_pad_last * 4
    act_bytes = 4 * TB * max(w.shape[1] for w, _ in layers) * 4   # headroom
    # TODO(synk): if resident weights exceed ~48 MiB (v7x VMEM budget), stream
    # w_i from HBM instead (memory_space=pl.ANY + pltpu.emit_pipeline /
    # make_async_copy double-buffered over layers).
    vmem_limit = int(min(max(2 * w_bytes + io_bytes + act_bytes + (4 << 20),
                             16 << 20), 64 << 20))

    # NOTE: switch to bfloat16 here (and in the kernel's final astype) if the
    # consumer tolerates it, halving write-back HBM traffic.
    out_shape = jax.ShapeDtypeStruct((B_pad, out_pad_last), jnp.float32)

    x_spec = pl.BlockSpec((TB, in_dim), lambda gi: (gi, 0))
    out_spec = pl.BlockSpec((TB, out_pad_last), lambda gi: (gi, 0))

    def wb_specs(single_buffer):
        specs = []
        for w, b in layers:
            if single_buffer:
                # Constant index_map -> double buffering buys nothing; keep one
                # resident copy of each weight/bias tile.
                specs.append(pl.BlockSpec(w.shape, lambda gi: (0, 0),
                                          pipeline_mode=pl.Buffered(1)))
                specs.append(pl.BlockSpec(b.shape, lambda gi: (0, 0),
                                          pipeline_mode=pl.Buffered(1)))
            else:
                specs.append(pl.BlockSpec(w.shape, lambda gi: (0, 0)))
                specs.append(pl.BlockSpec(b.shape, lambda gi: (0, 0)))
        return specs

    def run(single_buffer):
        grid_spec = pltpu.PrefetchScalarGridSpec(
            num_scalar_prefetch=0,
            grid=grid,
            in_specs=[x_spec, *wb_specs(single_buffer)],
            out_specs=out_spec,
        )
        return pl.pallas_call(
            fcnet_fused_kernel,
            out_shape=out_shape,
            grid_spec=grid_spec,
            compiler_params=pltpu.CompilerParams(
                dimension_semantics=("parallel",),   # megacore sharding on v7x
                vmem_limit_bytes=vmem_limit),
        )(x_in, *flat_wb)

    try:
        out_pad = run(single_buffer=True)
    except Exception:
        # Some JAX versions reject buffer_count=1; fall back to default
        # double-buffering (correctness identical, slightly more VMEM).
        out_pad = run(single_buffer=False)

    return out_pad[:B, :out_dim]


def init_fcnet_params(dims, key):
    """Deterministic parameters matching FCNet(dims): every Linear wrapped in
    weight_norm(dim=None) and followed by LeakyReLU.  Returns [(v, g, b), ...]."""
    params = []
    for i in range(len(dims) - 1):
        in_dim, out_dim = dims[i], dims[i + 1]
        key, k1, k2 = jax.random.split(key, 3)
        bound = 1.0 / np.sqrt(in_dim)
        v = jax.random.uniform(k1, (out_dim, in_dim), jnp.float32, -bound, bound)
        b = jax.random.uniform(k2, (out_dim,), jnp.float32, -bound, bound)
        # PyTorch weight_norm(dim=None) initializes g = ||v||_F (scalar).
        g = jnp.sqrt(jnp.sum(v * v)).reshape(1)
        params.append((v, g, b))
    return params


def fcnet_reference(x, params):
    """Pure-JAX f32 reference for correctness check."""
    h = x
    for v, g, b in params:
        w = v * (g[0] / jnp.sqrt(jnp.sum(v * v)))
        y = h @ w.T + b
        h = jnp.where(y > 0, y, NEG_SLOPE * y)
    return h


if __name__ == "__main__":
    dims = [16, 32, 8]       # FCNet([16, 32, 8]): 16->32->8, LeakyReLU after each
    batch = 8

    key = jax.random.PRNGKey(0)
    key, kx = jax.random.split(key)
    x = jax.random.normal(kx, (batch, dims[0]), jnp.float32)

    params = init_fcnet_params(dims, key)
    prepared = prepare_fcnet_params(params)    # one-time, parameter-only prep

    out = jax.block_until_ready(fcnet_forward(x, prepared))
    ref = fcnet_reference(x, params)

    # bf16 MXU inputs -> tolerance relaxed from 1e-4 to ~1e-2 relative.
    np.testing.assert_allclose(np.asarray(out), np.asarray(ref),
                               rtol=2e-2, atol=2e-2)
    print("KERNEL_OK")
</pallas_src>

<mosaic_0001>
module attributes {stable_mosaic.version = 11 : i64} {
  func.func @fcnet_fused_kernel(%arg0: i32, %arg1: memref<8x16xf32, #tpu.memory_space<vmem>>, %arg2: memref<16x128xbf16, #tpu.memory_space<vmem>>, %arg3: memref<1x128xf32, #tpu.memory_space<vmem>>, %arg4: memref<128x128xbf16, #tpu.memory_space<vmem>>, %arg5: memref<1x128xf32, #tpu.memory_space<vmem>>, %arg6: memref<8x128xf32, #tpu.memory_space<vmem>>) attributes {dimension_semantics = [#tpu.dimension_semantics<parallel>], iteration_bounds = array<i64: 1>, scalar_prefetch = 0 : i64, scratch_operands = 0 : i64, tpu.core_type = #tpu.core_type<tc>, window_params = [{transform_indices = @transform_0, window_bounds = array<i64: 8, 16>}, {pipeline_mode = #tpu.pipeline_mode<synchronous>, transform_indices = @transform_1, window_bounds = array<i64: 16, 128>}, {pipeline_mode = #tpu.pipeline_mode<synchronous>, transform_indices = @transform_2, window_bounds = array<i64: 1, 128>}, {pipeline_mode = #tpu.pipeline_mode<synchronous>, transform_indices = @transform_3, window_bounds = array<i64: 128, 128>}, {pipeline_mode = #tpu.pipeline_mode<synchronous>, transform_indices = @transform_4, window_bounds = array<i64: 1, 128>}, {transform_indices = @transform_5, window_bounds = array<i64: 8, 128>}]} {
    %c0 = arith.constant 0 : index
    %c0_0 = arith.constant 0 : index
    %0 = vector.load %arg1[%c0, %c0_0] : memref<8x16xf32, #tpu.memory_space<vmem>>, vector<8x16xf32>
    %c0_1 = arith.constant 0 : index
    %c0_2 = arith.constant 0 : index
    %1 = vector.load %arg2[%c0_1, %c0_2] : memref<16x128xbf16, #tpu.memory_space<vmem>>, vector<16x128xbf16>
    %c0_3 = arith.constant 0 : index
    %c0_4 = arith.constant 0 : index
    %2 = vector.load %arg3[%c0_3, %c0_4] : memref<1x128xf32, #tpu.memory_space<vmem>>, vector<1x128xf32>
    %3 = arith.truncf %0 : vector<8x16xf32> to vector<8x16xbf16>
    %cst = arith.constant dense<0.000000e+00> : vector<8x128xf32>
    %4 = tpu.matmul %3, %1, %cst {dimension_numbers = #tpu.dot_dimension_numbers<[1], [0], [0], [1], [0, 0, 1, 1], [], []>} : vector<8x16xbf16>, vector<16x128xbf16>, vector<8x128xf32> -> vector<8x128xf32>
    %5 = vector.broadcast %2 : vector<1x128xf32> to vector<8x128xf32>
    %6 = arith.addf %4, %5 : vector<8x128xf32>
    %cst_5 = arith.constant 0.00999999977 : f32
    %7 = vector.broadcast %cst_5 : f32 to vector<8x128xf32>
    %8 = arith.mulf %7, %6 : vector<8x128xf32>
    %9 = arith.maximumf %6, %8 : vector<8x128xf32>
    %c0_6 = arith.constant 0 : index
    %c0_7 = arith.constant 0 : index
    %10 = vector.load %arg4[%c0_6, %c0_7] : memref<128x128xbf16, #tpu.memory_space<vmem>>, vector<128x128xbf16>
    %c0_8 = arith.constant 0 : index
    %c0_9 = arith.constant 0 : index
    %11 = vector.load %arg5[%c0_8, %c0_9] : memref<1x128xf32, #tpu.memory_space<vmem>>, vector<1x128xf32>
    %12 = arith.truncf %9 : vector<8x128xf32> to vector<8x128xbf16>
    %cst_10 = arith.constant dense<0.000000e+00> : vector<8x128xf32>
    %13 = tpu.matmul %12, %10, %cst_10 {dimension_numbers = #tpu.dot_dimension_numbers<[1], [0], [0], [1], [0, 0, 1, 1], [], []>} : vector<8x128xbf16>, vector<128x128xbf16>, vector<8x128xf32> -> vector<8x128xf32>
    %14 = vector.broadcast %11 : vector<1x128xf32> to vector<8x128xf32>
    %15 = arith.addf %13, %14 : vector<8x128xf32>
    %cst_11 = arith.constant 0.00999999977 : f32
    %16 = vector.broadcast %cst_11 : f32 to vector<8x128xf32>
    %17 = arith.mulf %16, %15 : vector<8x128xf32>
    %18 = arith.maximumf %15, %17 : vector<8x128xf32>
    %c0_12 = arith.constant 0 : index
    %c0_13 = arith.constant 0 : index
    %19 = vector.load %arg6[%c0_12, %c0_13] : memref<8x128xf32, #tpu.memory_space<vmem>>, vector<8x128xf32>
    tpu.vector_store %arg6[%c0_12, %c0_13], %18 {strides = array<i32>} : memref<8x128xf32, #tpu.memory_space<vmem>>, vector<8x128xf32>,
    return
  }
  func.func @transform_0(%arg0: i32) -> (i32, i32) {
    %c0_i32 = arith.constant 0 : i32
    %c0_i32_0 = arith.constant 0 : i32
    return %arg0, %c0_i32 : i32, i32
  }
  func.func @transform_1(%arg0: i32) -> (i32, i32) {
    %c0_i32 = arith.constant 0 : i32
    %c0_i32_0 = arith.constant 0 : i32
    %c0_i32_1 = arith.constant 0 : i32
    return %c0_i32, %c0_i32_0 : i32, i32
  }
  func.func @transform_2(%arg0: i32) -> (i32, i32) {
    %c0_i32 = arith.constant 0 : i32
    %c0_i32_0 = arith.constant 0 : i32
    %c0_i32_1 = arith.constant 0 : i32
    return %c0_i32, %c0_i32_0 : i32, i32
  }
  func.func @transform_3(%arg0: i32) -> (i32, i32) {
    %c0_i32 = arith.constant 0 : i32
    %c0_i32_0 = arith.constant 0 : i32
    %c0_i32_1 = arith.constant 0 : i32
    return %c0_i32, %c0_i32_0 : i32, i32
  }
  func.func @transform_4(%arg0: i32) -> (i32, i32) {
    %c0_i32 = arith.constant 0 : i32
    %c0_i32_0 = arith.constant 0 : i32
    %c0_i32_1 = arith.constant 0 : i32
    return %c0_i32, %c0_i32_0 : i32, i32
  }
  func.func @transform_5(%arg0: i32) -> (i32, i32) {
    %c0_i32 = arith.constant 0 : i32
    %c0_i32_0 = arith.constant 0 : i32
    return %arg0, %c0_i32 : i32, i32
  }
}

module attributes {stable_mosaic.version = 11 : i64} {
  func.func @fcnet_fused_kernel(%arg0: i32, %arg1: memref<8x16xf32, #tpu.memory_space<vmem>>, %arg2: memref<16x128xbf16, #tpu.memory_space<vmem>>, %arg3: memref<1x128xf32, #tpu.memory_space<vmem>>, %arg4: memref<128x128xbf16, #tpu.memory_space<vmem>>, %arg5: memref<1x128xf32, #tpu.memory_space<vmem>>, %arg6: memref<8x128xf32, #tpu.memory_space<vmem>>) attributes {dimension_semantics = [#tpu.dimension_semantics<parallel>], iteration_bounds = array<i64: 1>, scalar_prefetch = 0 : i64, scratch_operands = 0 : i64, tpu.core_type = #tpu.core_type<tc>, window_params = [{transform_indices = @transform_0, window_bounds = array<i64: 8, 16>}, {pipeline_mode = #tpu.pipeline_mode<synchronous>, transform_indices = @transform_1, window_bounds = array<i64: 16, 128>}, {pipeline_mode = #tpu.pipeline_mode<synchronous>, transform_indices = @transform_2, window_bounds = array<i64: 1, 128>}, {pipeline_mode = #tpu.pipeline_mode<synchronous>, transform_indices = @transform_3, window_bounds = array<i64: 128, 128>}, {pipeline_mode = #tpu.pipeline_mode<synchronous>, transform_indices = @transform_4, window_bounds = array<i64: 1, 128>}, {transform_indices = @transform_5, window_bounds = array<i64: 8, 128>}]} {
    %c0 = arith.constant 0 : index
    %c0_0 = arith.constant 0 : index
    %0 = vector.load %arg1[%c0, %c0_0] : memref<8x16xf32, #tpu.memory_space<vmem>>, vector<8x16xf32>
    %c0_1 = arith.constant 0 : index
    %c0_2 = arith.constant 0 : index
    %1 = vector.load %arg2[%c0_1, %c0_2] : memref<16x128xbf16, #tpu.memory_space<vmem>>, vector<16x128xbf16>
    %c0_3 = arith.constant 0 : index
    %c0_4 = arith.constant 0 : index
    %2 = vector.load %arg3[%c0_3, %c0_4] : memref<1x128xf32, #tpu.memory_space<vmem>>, vector<1x128xf32>
    %3 = arith.truncf %0 : vector<8x16xf32> to vector<8x16xbf16>
    %cst = arith.constant dense<0.000000e+00> : vector<8x128xf32>
    %4 = tpu.matmul %3, %1, %cst {dimension_numbers = #tpu.dot_dimension_numbers<[1], [0], [0], [1], [0, 0, 1, 1], [], []>} : vector<8x16xbf16>, vector<16x128xbf16>, vector<8x128xf32> -> vector<8x128xf32>
    %5 = vector.broadcast %2 : vector<1x128xf32> to vector<8x128xf32>
    %6 = arith.addf %4, %5 : vector<8x128xf32>
    %cst_5 = arith.constant 0.00999999977 : f32
    %7 = vector.broadcast %cst_5 : f32 to vector<8x128xf32>
    %8 = arith.mulf %7, %6 : vector<8x128xf32>
    %9 = arith.maximumf %6, %8 : vector<8x128xf32>
    %c0_6 = arith.constant 0 : index
    %c0_7 = arith.constant 0 : index
    %10 = vector.load %arg4[%c0_6, %c0_7] : memref<128x128xbf16, #tpu.memory_space<vmem>>, vector<128x128xbf16>
    %c0_8 = arith.constant 0 : index
    %c0_9 = arith.constant 0 : index
    %11 = vector.load %arg5[%c0_8, %c0_9] : memref<1x128xf32, #tpu.memory_space<vmem>>, vector<1x128xf32>
    %12 = arith.truncf %9 : vector<8x128xf32> to vector<8x128xbf16>
    %cst_10 = arith.constant dense<0.000000e+00> : vector<8x128xf32>
    %13 = tpu.matmul %12, %10, %cst_10 {dimension_numbers = #tpu.dot_dimension_numbers<[1], [0], [0], [1], [0, 0, 1, 1], [], []>} : vector<8x128xbf16>, vector<128x128xbf16>, vector<8x128xf32> -> vector<8x128xf32>
    %14 = vector.broadcast %11 : vector<1x128xf32> to vector<8x128xf32>
    %15 = arith.addf %13, %14 : vector<8x128xf32>
    %cst_11 = arith.constant 0.00999999977 : f32
    %16 = vector.broadcast %cst_11 : f32 to vector<8x128xf32>
    %17 = arith.mulf %16, %15 : vector<8x128xf32>
    %18 = arith.maximumf %15, %17 : vector<8x128xf32>
    %c0_12 = arith.constant 0 : index
    %c0_13 = arith.constant 0 : index
    %19 = vector.load %arg6[%c0_12, %c0_13] : memref<8x128xf32, #tpu.memory_space<vmem>>, vector<8x128xf32>
    tpu.vector_store %arg6[%c0_12, %c0_13], %18 {strides = array<i32>} : memref<8x128xf32, #tpu.memory_space<vmem>>, vector<8x128xf32>,
    return
  }
  func.func @transform_0(%arg0: i32) -> (i32, i32) {
    %c0_i32 = arith.constant 0 : i32
    %c0_i32_0 = arith.constant 0 : i32
    return %arg0, %c0_i32 : i32, i32
  }
  func.func @transform_1(%arg0: i32) -> (i32, i32) {
    %c0_i32 = arith.constant 0 : i32
    %c0_i32_0 = arith.constant 0 : i32
    %c0_i32_1 = arith.constant 0 : i32
    return %c0_i32, %c0_i32_0 : i32, i32
  }
  func.func @transform_2(%arg0: i32) -> (i32, i32) {
    %c0_i32 = arith.constant 0 : i32
    %c0_i32_0 = arith.constant 0 : i32
    %c0_i32_1 = arith.constant 0 : i32
    return %c0_i32, %c0_i32_0 : i32, i32
  }
  func.func @transform_3(%arg0: i32) -> (i32, i32) {
    %c0_i32 = arith.constant 0 : i32
    %c0_i32_0 = arith.constant 0 : i32
    %c0_i32_1 = arith.constant 0 : i32
    return %c0_i32, %c0_i32_0 : i32, i32
  }
  func.func @transform_4(%arg0: i32) -> (i32, i32) {
    %c0_i32 = arith.constant 0 : i32
    %c0_i32_0 = arith.constant 0 : i32
    %c0_i32_1 = arith.constant 0 : i32
    return %c0_i32, %c0_i32_0 : i32, i32
  }
  func.func @transform_5(%arg0: i32) -> (i32, i32) {
    %c0_i32 = arith.constant 0 : i32
    %c0_i32_0 = arith.constant 0 : i32
    return %arg0, %c0_i32 : i32, i32
  }
}

</mosaic_0001>

<bundles_post_ra>
// kernel: tpu_custom_call.1
= control target key start
LH: loop header
LB: loop body
LE: loop exit
PB: predicated region body
PF: predicated region fallthrough
CT: control target
= control target key end

     0   :  { %10 = vsyncpa [#allocation3], 0  ;;  %s413_s0 = inlined_call_operand.hbm [shape: f32[8,16], index: 0, kind: input, shape index: {}]   ;;  %s414_s1 = inlined_call_operand.hbm [shape: bf16[16,128], index: 1, kind: input, shape index: {}]   ;;  %s415_s2 = inlined_call_operand.vmem [shape: f32[1,128], index: 2, kind: input, shape index: {}]   ;;  %s416_s3 = inlined_call_operand.hbm [shape: bf16[128,128], index: 3, kind: input, shape index: {}]   ;;  %s417_s4 = inlined_call_operand.vmem [shape: f32[1,128], index: 4, kind: input, shape index: {}]   ;;  %s418_s5 = inlined_call_operand.hbm [shape: f32[8,128], index: 5, kind: output, shape index: {}]  }
   0x1   :  { %11 = vsyncpa [#allocation6], 0  ;;  %s28_s20 = sshll.u32 %s414_s1, 4  ;;  %s29_s20 = int_to_ptr.hbm [resolvable:$true] %s28_s20 }
   0x2   :  { %12 = vsyncpa [#allocation4], 0  ;;  %s359_s21 = smov [#allocation5]   ;;  %s18_s25 = sshll.u32 %s413_s0, 4  ;;  %s19_s25 = int_to_ptr.hbm [resolvable:$true] %s18_s25 }
   0x3   :  { %s30_s22 = sshll.u32 %s359_s21, 4  ;;  %s360_s26 = smov 64   ;;  %s31_s22 = int_to_ptr.vmem [resolvable:$true] %s30_s22 }
   0x4   :  { %s361_s27 = smov 4   ;;  %s362_s28 = smov [#allocation2]  }
   0x5   :  { %36 = dma.hbm_to_vmem [thread:$0]  %s29_s20, 128, %s31_s22, [#allocation6], %s360_s26, %s360_s26, %s361_s27  }
   0x6   :  { %s20_s29 = sshll.u32 %s362_s28, 4  ;;  %s43_s7 = sshll.u32 %s416_s3, 4  ;;  %s21_s29 = int_to_ptr.vmem [resolvable:$true] %s20_s29  ;;  %s44_s7 = int_to_ptr.hbm [resolvable:$true] %s43_s7 }
   0x7   :  { %23 = dma.hbm_to_vmem [thread:$0]  %s19_s25, 128, %s21_s29, [#allocation3]  }
   0x8   :  { %s363_s1 = smov [#allocation7]  }
   0x9   :  { %s45_s8 = sshll.u32 %s363_s1, 4  ;;  %s46_s8 = int_to_ptr.vmem [resolvable:$true] %s45_s8 }
   0xa   :  { %51 = dma.hbm_to_vmem [thread:$0]  %s44_s7, 1024, %s46_s8, [#allocation6], %s360_s26, %s360_s26, %s361_s27  }
   0xb   :  { %353 = dma.done.wait [#allocation3], 128  }
   0xc   :  { %354 = vsyncadd [#allocation3], 4294967168 }
   0xd   :  { %355 = dma.done.wait [#allocation6], 1152  }
   0xe   :  { %356 = vsyncadd [#allocation6], 4294966144  ;;  %v240_v0 = vld [vmem:[#allocation5] sm:$0xff]  ;;  %v67_v1 = vld [vmem:[#allocation2] sm:$0xff]  ;;  %vm81_vm0 = vcmask 130048   ;;  %s364_s11 = smov [#allocation8]  }
   0xf   :  { %v248_v2 = vld [vmem:[#allocation7 + $0x38] sm:$0xff]  ;;  %v71_v3 = vpack.c.bf16 %v67_v1, %v67_v1  ;;  %92 = vmatpush.bf16.msra.mxu0 %v240_v0  ;;  %v247_v4 = vld [vmem:[#allocation7 + $0x30] sm:$0xff]  ;;  %v246_v5 = vld [vmem:[#allocation7 + $0x28] sm:$0xff]  ;;  %s190_s12 = sshll.u32 %s364_s11, 4  ;;  %s192_s15 = sshll.u32 %s418_s5, 4  ;;  %s191_s12 = int_to_ptr.vmem [resolvable:$true] %s190_s12  ;;  %s193_s15 = int_to_ptr.hbm [resolvable:$true] %s192_s15 }
  0x10   :  { %169 = vmatpush.bf16.msra.mxu1 %v248_v2  ;;  %v245_v6 = vld [vmem:[#allocation7 + $0x20] sm:$0xff]  ;;  %v244_v7 = vld [vmem:[#allocation7 + $0x18] sm:$0xff]  ;;  %v243_v8 = vld [vmem:[#allocation7 + $0x10] sm:$0xff] }
  0x11   :  { %v242_v9 = vld [vmem:[#allocation7 + $0x8] sm:$0xff]  ;;  %v241_v10 = vld [vmem:[#allocation7] sm:$0xff]  ;;  %v255_v11 = vld [vmem:[%s415_s2] ss:$0 sm:$0xff] }
  0x12   :  { %207 = vmatmul.msk.bf16.vlgmr.msra.gmra.mxu0 %vm81_vm0, %v71_v3  ;;  %v256_v18 = vld [vmem:[%s417_s4] ss:$0 sm:$0xff] }
  0x14   :  { %170 = vmatpush.bf16.msra.mxu1 %v247_v4 }
  0x18   :  { %171 = vmatpush.bf16.msra.mxu1 %v246_v5 }
  0x1c   :  { %172 = vmatpush.bf16.msra.mxu1 %v245_v6 }
  0x20   :  { %173 = vmatpush.bf16.msra.mxu1 %v244_v7 }
  0x24   :  { %174 = vmatpush.bf16.msra.mxu1 %v243_v8 }
  0x28   :  { %175 = vmatpush.bf16.msra.mxu1 %v242_v9 }
  0x2c   :  { %176 = vmatpush.bf16.msra.mxu1 %v241_v10 }
  0x8f   :  { %v94_v12 = vpop.f32.mrf.mxu0 }
  0x90   :  { %v95_v13 = vadd.f32 %v255_v11, %v94_v12 }
  0x92   :  { %v98_v14 = vmul.f32 0.01, %v95_v13 }
  0x94   :  { %v99_v15 = vmax.f32 %v95_v13, %v98_v14 }
  0x96   :  { %v117_v16 = vpack.c.bf16 %v99_v15, %v99_v15 }
  0x97   :  { %v96_v17 = vpop.f32.mrf.mxu0 }
  0x98   :  { %177 = vmatmul.bf16.vlgmr.msra.gmra.mxu1 %v117_v16 }
 0x115   :  { %v178_v19 = vpop.f32.mrf.mxu1 }
 0x116   :  { %v179_v20 = vadd.f32 %v256_v18, %v178_v19 }
 0x118   :  { %v182_v21 = vmul.f32 0.01, %v179_v20 }
 0x11a   :  { %v183_v22 = vmax.f32 %v179_v20, %v182_v21 }
 0x11c   :  { %184 = vst [vmem:[#allocation8] sm:$0xff] %v183_v22 }
 0x11d   :  { %v180_v23 = vpop.f32.mrf.mxu1  ;;  %195 = dma.vmem_to_hbm [thread:$0]  %s191_s12, 128, %s193_s15, [#allocation4]  }
 0x11e   :  { %357 = dma.done.wait [#allocation4], 128  }
 0x11f   :  { %358 = vsyncadd [#allocation4], 4294967168 }
 0x120   :  { %200 = vsyncpa [#allocation3], 1 }
 0x121   :  { %201 = vsyncpa [#allocation6], 1 }
 0x122   :  { %202 = vsyncpa [#allocation4], 1 }

// kernel: tpu_custom_call.1
= control target key start
LH: loop header
LB: loop body
LE: loop exit
PB: predicated region body
PF: predicated region fallthrough
CT: control target
= control target key end

     0   :  { %10 = vsyncpa [#allocation3], 0  ;;  %s413_s0 = inlined_call_operand.hbm [shape: f32[8,16], index: 0, kind: input, shape index: {}]   ;;  %s414_s1 = inlined_call_operand.hbm [shape: bf16[16,128], index: 1, kind: input, shape index: {}]   ;;  %s415_s2 = inlined_call_operand.vmem [shape: f32[1,128], index: 2, kind: input, shape index: {}]   ;;  %s416_s3 = inlined_call_operand.hbm [shape: bf16[128,128], index: 3, kind: input, shape index: {}]   ;;  %s417_s4 = inlined_call_operand.vmem [shape: f32[1,128], index: 4, kind: input, shape index: {}]   ;;  %s418_s5 = inlined_call_operand.hbm [shape: f32[8,128], index: 5, kind: output, shape index: {}]  }
   0x1   :  { %11 = vsyncpa [#allocation6], 0  ;;  %s28_s20 = sshll.u32 %s414_s1, 4  ;;  %s29_s20 = int_to_ptr.hbm [resolvable:$true] %s28_s20 }
   0x2   :  { %12 = vsyncpa [#allocation4], 0  ;;  %s359_s21 = smov [#allocation5]   ;;  %s18_s25 = sshll.u32 %s413_s0, 4  ;;  %s19_s25 = int_to_ptr.hbm [resolvable:$true] %s18_s25 }
   0x3   :  { %s30_s22 = sshll.u32 %s359_s21, 4  ;;  %s360_s26 = smov 64   ;;  %s31_s22 = int_to_ptr.vmem [resolvable:$true] %s30_s22 }
   0x4   :  { %s361_s27 = smov 4   ;;  %s362_s28 = smov [#allocation2]  }
   0x5   :  { %36 = dma.hbm_to_vmem [thread:$0]  %s29_s20, 128, %s31_s22, [#allocation6], %s360_s26, %s360_s26, %s361_s27  }
   0x6   :  { %s20_s29 = sshll.u32 %s362_s28, 4  ;;  %s43_s7 = sshll.u32 %s416_s3, 4  ;;  %s21_s29 = int_to_ptr.vmem [resolvable:$true] %s20_s29  ;;  %s44_s7 = int_to_ptr.hbm [resolvable:$true] %s43_s7 }
   0x7   :  { %23 = dma.hbm_to_vmem [thread:$0]  %s19_s25, 128, %s21_s29, [#allocation3]  }
   0x8   :  { %s363_s1 = smov [#allocation7]  }
   0x9   :  { %s45_s8 = sshll.u32 %s363_s1, 4  ;;  %s46_s8 = int_to_ptr.vmem [resolvable:$true] %s45_s8 }
   0xa   :  { %51 = dma.hbm_to_vmem [thread:$0]  %s44_s7, 1024, %s46_s8, [#allocation6], %s360_s26, %s360_s26, %s361_s27  }
   0xb   :  { %353 = dma.done.wait [#allocation3], 128  }
   0xc   :  { %354 = vsyncadd [#allocation3], 4294967168 }
   0xd   :  { %355 = dma.done.wait [#allocation6], 1152  }
   0xe   :  { %356 = vsyncadd [#allocation6], 4294966144  ;;  %v240_v0 = vld [vmem:[#allocation5] sm:$0xff]  ;;  %v67_v1 = vld [vmem:[#allocation2] sm:$0xff]  ;;  %vm81_vm0 = vcmask 130048   ;;  %s364_s11 = smov [#allocation8]  }
   0xf   :  { %v248_v2 = vld [vmem:[#allocation7 + $0x38] sm:$0xff]  ;;  %v71_v3 = vpack.c.bf16 %v67_v1, %v67_v1  ;;  %92 = vmatpush.bf16.msra.mxu0 %v240_v0  ;;  %v247_v4 = vld [vmem:[#allocation7 + $0x30] sm:$0xff]  ;;  %v246_v5 = vld [vmem:[#allocation7 + $0x28] sm:$0xff]  ;;  %s190_s12 = sshll.u32 %s364_s11, 4  ;;  %s192_s15 = sshll.u32 %s418_s5, 4  ;;  %s191_s12 = int_to_ptr.vmem [resolvable:$true] %s190_s12  ;;  %s193_s15 = int_to_ptr.hbm [resolvable:$true] %s192_s15 }
  0x10   :  { %169 = vmatpush.bf16.msra.mxu1 %v248_v2  ;;  %v245_v6 = vld [vmem:[#allocation7 + $0x20] sm:$0xff]  ;;  %v244_v7 = vld [vmem:[#allocation7 + $0x18] sm:$0xff]  ;;  %v243_v8 = vld [vmem:[#allocation7 + $0x10] sm:$0xff] }
  0x11   :  { %v242_v9 = vld [vmem:[#allocation7 + $0x8] sm:$0xff]  ;;  %v241_v10 = vld [vmem:[#allocation7] sm:$0xff]  ;;  %v255_v11 = vld [vmem:[%s415_s2] ss:$0 sm:$0xff] }
  0x12   :  { %207 = vmatmul.msk.bf16.vlgmr.msra.gmra.mxu0 %vm81_vm0, %v71_v3  ;;  %v256_v18 = vld [vmem:[%s417_s4] ss:$0 sm:$0xff] }
  0x14   :  { %170 = vmatpush.bf16.msra.mxu1 %v247_v4 }
  0x18   :  { %171 = vmatpush.bf16.msra.mxu1 %v246_v5 }
  0x1c   :  { %172 = vmatpush.bf16.msra.mxu1 %v245_v6 }
  0x20   :  { %173 = vmatpush.bf16.msra.mxu1 %v244_v7 }
  0x24   :  { %174 = vmatpush.bf16.msra.mxu1 %v243_v8 }
  0x28   :  { %175 = vmatpush.bf16.msra.mxu1 %v242_v9 }
  0x2c   :  { %176 = vmatpush.bf16.msra.mxu1 %v241_v10 }
  0x8f   :  { %v94_v12 = vpop.f32.mrf.mxu0 }
  0x90   :  { %v95_v13 = vadd.f32 %v255_v11, %v94_v12 }
  0x92   :  { %v98_v14 = vmul.f32 0.01, %v95_v13 }
  0x94   :  { %v99_v15 = vmax.f32 %v95_v13, %v98_v14 }
  0x96   :  { %v117_v16 = vpack.c.bf16 %v99_v15, %v99_v15 }
  0x97   :  { %v96_v17 = vpop.f32.mrf.mxu0 }
  0x98   :  { %177 = vmatmul.bf16.vlgmr.msra.gmra.mxu1 %v117_v16 }
 0x115   :  { %v178_v19 = vpop.f32.mrf.mxu1 }
 0x116   :  { %v179_v20 = vadd.f32 %v256_v18, %v178_v19 }
 0x118   :  { %v182_v21 = vmul.f32 0.01, %v179_v20 }
 0x11a   :  { %v183_v22 = vmax.f32 %v179_v20, %v182_v21 }
 0x11c   :  { %184 = vst [vmem:[#allocation8] sm:$0xff] %v183_v22 }
 0x11d   :  { %v180_v23 = vpop.f32.mrf.mxu1  ;;  %195 = dma.vmem_to_hbm [thread:$0]  %s191_s12, 128, %s193_s15, [#allocation4]  }
 0x11e   :  { %357 = dma.done.wait [#allocation4], 128  }
 0x11f   :  { %358 = vsyncadd [#allocation4], 4294967168 }
 0x120   :  { %200 = vsyncpa [#allocation3], 1 }
 0x121   :  { %201 = vsyncpa [#allocation6], 1 }
 0x122   :  { %202 = vsyncpa [#allocation4], 1 }

</bundles_post_ra>
